<compile_context>
chip_gen: v7x
topology: tpu7x:2x2x1
jax: 0.10.0
libtpu: 0.0.40
codegen_flags: <defaults>
</compile_context>

<pallas_src>
import functools

import jax
import jax.numpy as jnp
from jax.experimental import pallas as pl
from jax.experimental.pallas import tpu as pltpu

EFF_V2_SETTINGS = {
    "s": [[1, 3, 1, 24, 24, 2, True],
          [4, 3, 2, 24, 48, 4, True],
          [4, 3, 2, 48, 64, 4, True],
          [4, 3, 2, 64, 128, 6, False],
          [6, 3, 1, 128, 160, 9, False],
          [6, 3, 2, 160, 256, 15, False]],
}


def _round_up(x, m):
    return ((x + m - 1) // m) * m


# ----------------------------------------------------------------------------
# Pallas kernels
# ----------------------------------------------------------------------------
def _silu(y):
    # y * sigmoid(y); exp -> EUP, reciprocal avoids the VPU divide.
    return y * pl.reciprocal(1.0 + jnp.exp(-y))


def _sigmoid(y):
    return pl.reciprocal(1.0 + jnp.exp(-y))


def _conv_mm_kernel(*refs, act, has_scale, has_res):
    # Blocked, K-accumulated conv-as-matmul with fused BN (+SiLU) (+SE input
    # scale) (+residual) epilogue.
    #   x: (1, tm, tk) bf16   w: (tk, tn) bf16   s/b: (1, tn) f32
    #   [se: (1, 1, tk) bf16] [r: (1, tm, tn) bf16]   o: (1, tm, tn) bf16
    #   acc: (tm, tn) f32 scratch
    x_ref, w_ref, s_ref, b_ref = refs[:4]
    idx = 4
    se_ref = None
    r_ref = None
    if has_scale:
        se_ref = refs[idx]
        idx += 1
    if has_res:
        r_ref = refs[idx]
        idx += 1
    o_ref = refs[idx]
    acc_ref = refs[idx + 1]

    kb = pl.program_id(3)

    @pl.when(kb == 0)
    def _init():
        acc_ref[...] = jnp.zeros_like(acc_ref)

    xb = x_ref[0]
    if has_scale:
        xb = xb * se_ref[0]                       # per-(batch, channel) SE scale
    acc_ref[...] += jnp.dot(xb, w_ref[...], preferred_element_type=jnp.float32)

    @pl.when(kb == pl.num_programs(3) - 1)
    def _finalize():
        y = acc_ref[...] * s_ref[...] + b_ref[...]
        if act:
            y = _silu(y)
        if has_res:
            y = y + r_ref[0].astype(jnp.float32)  # fused residual add
        o_ref[0] = y.astype(o_ref.dtype)


@functools.partial(jax.jit, static_argnames=("act",))
def conv_matmul(x3, wmat, scale, bias, *, act, se_scale=None, residual=None):
    # x3: (N, M, K), wmat: (K, Cout) -> (N, M, Cout) bf16
    n, m, k = x3.shape
    cout = wmat.shape[1]

    tm = min(256, _round_up(m, 16))
    m_p = _round_up(m, tm)
    k_aligned = _round_up(k, 128)
    tk = k_aligned if k_aligned <= 1024 else 512
    k_p = _round_up(k, tk)
    tn = min(256, _round_up(cout, 128))
    n_p = _round_up(cout, tn)

    xp = jnp.pad(x3, ((0, 0), (0, m_p - m), (0, k_p - k))).astype(jnp.bfloat16)
    wp = jnp.pad(wmat, ((0, k_p - k), (0, n_p - cout))).astype(jnp.bfloat16)
    sp = jnp.pad(scale.reshape(1, cout), ((0, 0), (0, n_p - cout)))
    bp = jnp.pad(bias.reshape(1, cout), ((0, 0), (0, n_p - cout)))

    inputs = [xp, wp, sp, bp]
    in_specs = [
        pl.BlockSpec((1, tm, tk), lambda nb, i, j, kb: (nb, i, kb)),
        pl.BlockSpec((tk, tn), lambda nb, i, j, kb: (kb, j)),
        pl.BlockSpec((1, tn), lambda nb, i, j, kb: (0, j)),
        pl.BlockSpec((1, tn), lambda nb, i, j, kb: (0, j)),
    ]
    has_scale = se_scale is not None
    if has_scale:
        sep = jnp.pad(se_scale.reshape(n, 1, k),
                      ((0, 0), (0, 0), (0, k_p - k))).astype(jnp.bfloat16)
        inputs.append(sep)
        in_specs.append(pl.BlockSpec((1, 1, tk), lambda nb, i, j, kb: (nb, 0, kb)))
    has_res = residual is not None
    if has_res:
        rp = jnp.pad(residual, ((0, 0), (0, m_p - m), (0, n_p - cout)))
        inputs.append(rp)
        in_specs.append(pl.BlockSpec((1, tm, tn), lambda nb, i, j, kb: (nb, i, j)))

    grid = (n, m_p // tm, n_p // tn, k_p // tk)
    out = pl.pallas_call(
        functools.partial(_conv_mm_kernel, act=act,
                          has_scale=has_scale, has_res=has_res),
        out_shape=jax.ShapeDtypeStruct((n, m_p, n_p), jnp.bfloat16),
        grid_spec=pltpu.PrefetchScalarGridSpec(
            num_scalar_prefetch=0,
            grid=grid,
            in_specs=in_specs,
            out_specs=pl.BlockSpec((1, tm, tn), lambda nb, i, j, kb: (nb, i, j)),
            scratch_shapes=[pltpu.VMEM((tm, tn), jnp.float32)]),
        compiler_params=pltpu.CompilerParams(
            dimension_semantics=("parallel", "parallel", "parallel", "arbitrary")),
    )(*inputs)
    return out[:, :m, :cout]


def _dw_kernel(p_ref, w_ref, s_ref, b_ref, o_ref):
    # p: (KK, tm, C) bf16   w: (KK, C) f32   s/b: (1, C) f32 -> o: (tm, C) bf16
    kk = p_ref.shape[0]
    acc = p_ref[0].astype(jnp.float32) * w_ref[0:1, :]
    for t in range(1, kk):
        acc = acc + p_ref[t].astype(jnp.float32) * w_ref[t:t + 1, :]
    y = acc * s_ref[...] + b_ref[...]
    o_ref[...] = _silu(y).astype(o_ref.dtype)


@jax.jit
def dwconv_bn_act(patches, wdw, scale, bias):
    kk, m, c = patches.shape
    # keep the (kk, tm, c) input block at ~4 MiB so v7x (64 MiB VMEM) is safe
    budget = max(16, ((4 << 20) // (kk * c * 2)) // 16 * 16)
    tm = min(512, budget, _round_up(m, 16))
    m_p = _round_up(m, tm)
    pp = jnp.pad(patches, ((0, 0), (0, m_p - m), (0, 0))).astype(jnp.bfloat16)
    out = pl.pallas_call(
        _dw_kernel,
        out_shape=jax.ShapeDtypeStruct((m_p, c), jnp.bfloat16),
        grid_spec=pltpu.PrefetchScalarGridSpec(
            num_scalar_prefetch=0,
            grid=(m_p // tm,),
            in_specs=[pl.BlockSpec((kk, tm, c), lambda i: (0, i, 0)),
                      pl.BlockSpec((kk, c), lambda i: (0, 0)),
                      pl.BlockSpec((1, c), lambda i: (0, 0)),
                      pl.BlockSpec((1, c), lambda i: (0, 0))],
            out_specs=pl.BlockSpec((tm, c), lambda i: (i, 0))),
        compiler_params=pltpu.CompilerParams(
            dimension_semantics=("parallel",)),
    )(pp, wdw, scale.reshape(1, c), bias.reshape(1, c))
    return out[:m]


def _se_scale_kernel(x_ref, w1_ref, w2_ref, o_ref, acc_ref, *, inv_hw):
    # Tiled global-average-pool over HW, then the two tiny FCs + sigmoid.
    t = pl.program_id(0)

    @pl.when(t == 0)
    def _init():
        acc_ref[...] = jnp.zeros_like(acc_ref)

    acc_ref[...] += jnp.sum(x_ref[...].astype(jnp.float32), axis=1)

    @pl.when(t == pl.num_programs(0) - 1)
    def _finalize():
        pooled = acc_ref[...] * inv_hw
        h = jnp.dot(pooled, w1_ref[...], preferred_element_type=jnp.float32)
        h = _silu(h)
        s = jnp.dot(h, w2_ref[...], preferred_element_type=jnp.float32)
        o_ref[...] = _sigmoid(s)


@jax.jit
def se_scales(x3, w1, w2):
    # x3: (N, HW, C) bf16 -> (N, C) f32 sigmoid gate (multiply fused downstream)
    n, hw, c = x3.shape
    thw = min(512, _round_up(hw, 16))
    hw_p = _round_up(hw, thw)
    xp = jnp.pad(x3, ((0, 0), (0, hw_p - hw), (0, 0)))
    return pl.pallas_call(
        functools.partial(_se_scale_kernel, inv_hw=1.0 / hw),
        out_shape=jax.ShapeDtypeStruct((n, c), jnp.float32),
        grid_spec=pltpu.PrefetchScalarGridSpec(
            num_scalar_prefetch=0,
            grid=(hw_p // thw,),
            in_specs=[pl.BlockSpec((n, thw, c), lambda i: (0, i, 0)),
                      pl.BlockSpec(w1.shape, lambda i: (0, 0)),
                      pl.BlockSpec(w2.shape, lambda i: (0, 0))],
            out_specs=pl.BlockSpec((n, c), lambda i: (0, 0)),
            scratch_shapes=[pltpu.VMEM((n, c), jnp.float32)]),
        compiler_params=pltpu.CompilerParams(
            dimension_semantics=("arbitrary",)),
    )(xp, w1, w2)


def _pool_linear_kernel(x_ref, w_ref, b_ref, o_ref, *, inv_hw):
    pooled = jnp.sum(x_ref[...].astype(jnp.float32), axis=1) * inv_hw
    o_ref[...] = (jnp.dot(pooled, w_ref[...], preferred_element_type=jnp.float32)
                  + b_ref[...])


@jax.jit
def pool_linear(x3, w, b):
    # classifier head: tiny (N,1,1280) x (1280,1024-padded); lane-dense output.
    n, hw, c = x3.shape
    nc = w.shape[1]
    nc_p = _round_up(nc, 128)
    wp = jnp.pad(w, ((0, 0), (0, nc_p - nc)))
    bp = jnp.pad(b.reshape(1, nc), ((0, 0), (0, nc_p - nc)))
    out = pl.pallas_call(
        functools.partial(_pool_linear_kernel, inv_hw=1.0 / hw),
        out_shape=jax.ShapeDtypeStruct((n, nc_p), jnp.float32),
    )(x3, wp, bp)
    return out[:, :nc]


# ----------------------------------------------------------------------------
# JAX glue: patch extraction (im2col), layer/block application
# ----------------------------------------------------------------------------
def _patch_taps(x, kh, kw, stride, pad):
    n, h, w, _ = x.shape
    xp = jnp.pad(x, ((0, 0), (pad, pad), (pad, pad), (0, 0)))
    hout = (h + 2 * pad - kh) // stride + 1
    wout = (w + 2 * pad - kw) // stride + 1
    taps = []
    for dy in range(kh):
        for dx in range(kw):
            taps.append(xp[:, dy:dy + (hout - 1) * stride + 1:stride,
                           dx:dx + (wout - 1) * stride + 1:stride, :])
    return taps, hout, wout


def apply_conv_bn_act(x, p, residual=None, se_scale=None):
    k, stride, pad, act = p["k"], p["stride"], p["pad"], p["act"]
    n, h, w, c = x.shape
    cout = p["w"].shape[1]
    if k == 1:
        x3 = x.reshape(n, h * w, c)
        hout, wout = h, w
    else:
        taps, hout, wout = _patch_taps(x, k, k, stride, pad)
        # K ordered (tap-major, channel-minor) to match weight folding.
        patches = jnp.stack(taps, axis=3)                 # (n, ho, wo, kk, c)
        x3 = patches.reshape(n, hout * wout, k * k * c)
    res3 = residual.reshape(n, hout * wout, cout) if residual is not None else None
    out3 = conv_matmul(x3, p["w"], p["scale"], p["bias"], act=act,
                       se_scale=se_scale, residual=res3)
    return out3.reshape(n, hout, wout, cout)


def apply_dwconv_bn_act(x, p):
    k, stride, pad = p["k"], p["stride"], p["pad"]
    n, h, w, c = x.shape
    taps, hout, wout = _patch_taps(x, k, k, stride, pad)
    patches = jnp.stack(taps, axis=0).reshape(k * k, n * hout * wout, c)
    out2d = dwconv_bn_act(patches, p["w"], p["scale"], p["bias"])
    return out2d.reshape(n, hout, wout, c)


def apply_fused_mbconv(x, blk):
    # StochasticDepth is identity in eval; quant_skip == block input.
    residual = x if blk["use_residual"] else None
    if blk["pw"] is None:
        return apply_conv_bn_act(x, blk["conv"], residual=residual)
    y = apply_conv_bn_act(x, blk["conv"])
    return apply_conv_bn_act(y, blk["pw"], residual=residual)


def apply_mbconv(x, blk):
    residual = x if blk["use_residual"] else None
    y = apply_conv_bn_act(x, blk["expand"])
    y = apply_dwconv_bn_act(y, blk["dw"])
    n, h, w, c = y.shape
    y3 = y.reshape(n, h * w, c)
    gate = se_scales(y3, blk["se"]["w1"], blk["se"]["w2"])      # (N, C)
    p = blk["pw"]
    cout = p["w"].shape[1]
    res3 = residual.reshape(n, h * w, cout) if residual is not None else None
    out3 = conv_matmul(y3, p["w"], p["scale"], p["bias"], act=False,
                       se_scale=gate, residual=res3)            # SE + residual fused
    return out3.reshape(n, h, w, cout)


def efficientnetv2_forward(params, x_nchw):
    x = jnp.transpose(x_nchw, (0, 2, 3, 1)).astype(jnp.bfloat16)   # NCHW -> NHWC
    for layer in params["features"]:
        if layer["type"] == "conv":
            x = apply_conv_bn_act(x, layer)
        elif layer["type"] == "fused":
            x = apply_fused_mbconv(x, layer)
        else:
            x = apply_mbconv(x, layer)
    n, h, w, c = x.shape
    # classifier: AdaptiveAvgPool2d(1) + Flatten + Dropout(eval: identity) + Linear
    return pool_linear(x.reshape(n, h * w, c),
                       params["classifier"]["w"], params["classifier"]["b"])


# ----------------------------------------------------------------------------
# Deterministic parameter initialization (synthetic weights, PyTorch shapes)
# ----------------------------------------------------------------------------
def _bn_params(key, c):
    kg, kb, km, kv = jax.random.split(key, 4)
    gamma = 1.0 + 0.05 * jax.random.normal(kg, (c,), jnp.float32)
    beta = 0.05 * jax.random.normal(kb, (c,), jnp.float32)
    mean = 0.05 * jax.random.normal(km, (c,), jnp.float32)
    var = 1.0 + 0.5 * jax.random.uniform(kv, (c,), jnp.float32)
    eps = 1e-5
    scale = gamma / jnp.sqrt(var + eps)
    bias = beta - mean * scale
    return scale, bias


def _conv_params(key, cin, cout, k, stride, pad, act, groups=1):
    kw_, kbn = jax.random.split(key)
    cin_g = cin // groups
    fan_in = cin_g * k * k
    w_torch = (jax.random.normal(kw_, (cout, cin_g, k, k), jnp.float32)
               / jnp.sqrt(fan_in))
    scale, bias = _bn_params(kbn, cout)
    if groups == 1:
        w_mat = jnp.transpose(w_torch, (2, 3, 1, 0)).reshape(k * k * cin, cout)
        return {"type": "conv", "w": w_mat, "scale": scale, "bias": bias,
                "k": k, "stride": stride, "pad": pad, "act": act}
    # depthwise: groups == cin == cout, cin_g == 1
    w_dw = jnp.transpose(w_torch[:, 0, :, :], (1, 2, 0)).reshape(k * k, cout)
    return {"w": w_dw, "scale": scale, "bias": bias,
            "k": k, "stride": stride, "pad": pad}


def _se_params(key, c, cr):
    k1, k2 = jax.random.split(key)
    w1_t = jax.random.normal(k1, (cr, c, 1, 1), jnp.float32) / jnp.sqrt(c)
    w2_t = jax.random.normal(k2, (c, cr, 1, 1), jnp.float32) / jnp.sqrt(cr)
    w1 = w1_t[:, :, 0, 0].T          # (c, cr)
    w2 = w2_t[:, :, 0, 0].T          # (cr, c)
    # zero-pad reduced dim to 128 lanes (exact: padded columns give silu(0)=0).
    crp = _round_up(cr, 128)
    w1 = jnp.pad(w1, ((0, 0), (0, crp - cr)))
    w2 = jnp.pad(w2, ((0, crp - cr), (0, 0)))
    return {"w1": w1, "w2": w2}


def init_efficientnetv2_params(key, version="s", num_classes=1000,
                               last_channel=1280):
    cfg = EFF_V2_SETTINGS[version]
    keys = iter(jax.random.split(key, 512))
    features = []
    # stem: BasicConvBnAct(3, cfg[0][3], k=3, stride=2, padding=1)
    features.append(_conv_params(next(keys), 3, cfg[0][3], 3, 2, 1, True))
    for exp, k, stride, n_in, n_out, num_layers, use_fused in cfg:
        for rep in range(num_layers):
            cin = n_in if rep == 0 else n_out
            s = stride if rep == 0 else 1
            use_res = (cin == n_out) and (s == 1)
            expanded = exp * cin
            if use_fused:
                conv = _conv_params(next(keys), cin, expanded, k, s,
                                    (k - 1) // 2, True)
                pw = (None if exp == 1 else
                      _conv_params(next(keys), expanded, n_out, 1, 1, 0, False))
                features.append({"type": "fused", "use_residual": use_res,
                                 "conv": conv, "pw": pw})
            else:
                reduced = cin // 4
                expand = _conv_params(next(keys), cin, expanded, 1, 1, 0, True)
                dw = _conv_params(next(keys), expanded, expanded, k, s,
                                  (k - 1) // 2, True, groups=expanded)
                se = _se_params(next(keys), expanded, reduced)
                pw = _conv_params(next(keys), expanded, n_out, 1, 1, 0, False)
                features.append({"type": "mb", "use_residual": use_res,
                                 "expand": expand, "dw": dw, "se": se, "pw": pw})
    # head: ConvBnAct(cfg[-1][4], last_channel, k_size=1)
    features.append(_conv_params(next(keys), cfg[-1][4], last_channel,
                                 1, 1, 0, True))
    # classifier Linear(last_channel, num_classes)
    kcw, kcb = jax.random.split(next(keys))
    w_lin = (jax.random.normal(kcw, (num_classes, last_channel), jnp.float32)
             / jnp.sqrt(last_channel))
    b_lin = 0.01 * jax.random.normal(kcb, (num_classes,), jnp.float32)
    return {"features": features,
            "classifier": {"w": w_lin.T, "b": b_lin}}


# ----------------------------------------------------------------------------
if __name__ == "__main__":
    key = jax.random.PRNGKey(0)
    pkey, xkey = jax.random.split(key)
    params = init_efficientnetv2_params(pkey, version="s", num_classes=1000)
    # Small input consistent with the module: NCHW, 3 channels, 32x32 spatial
    x = jax.random.normal(xkey, (2, 3, 32, 32), jnp.float32)
    logits = efficientnetv2_forward(params, x)
    logits = jax.block_until_ready(logits)
    assert logits.shape == (2, 1000), logits.shape
    assert bool(jnp.all(jnp.isfinite(logits)))
    print("KERNEL_OK")
</pallas_src>

<mosaic_0001>
module attributes {stable_mosaic.version = 11 : i64} {
  func.func @_conv_mm_kernel(%arg0: i32, %arg1: i32, %arg2: i32, %arg3: i32, %arg4: memref<1x256x128xbf16, #tpu.memory_space<vmem>>, %arg5: memref<128x128xbf16, #tpu.memory_space<vmem>>, %arg6: memref<1x128xf32, #tpu.memory_space<vmem>>, %arg7: memref<1x128xf32, #tpu.memory_space<vmem>>, %arg8: memref<1x256x128xbf16, #tpu.memory_space<vmem>>, %arg9: memref<256x128xf32, #tpu.memory_space<vmem>>) attributes {dimension_semantics = [#tpu.dimension_semantics<parallel>, #tpu.dimension_semantics<parallel>, #tpu.dimension_semantics<parallel>, #tpu.dimension_semantics<arbitrary>], iteration_bounds = array<i64: 2, 1, 1, 1>, scalar_prefetch = 0 : i64, scratch_operands = 1 : i64, tpu.core_type = #tpu.core_type<tc>, window_params = [{transform_indices = @transform_0, window_bounds = array<i64: 1, 256, 128>}, {transform_indices = @transform_1, window_bounds = array<i64: 128, 128>}, {transform_indices = @transform_2, window_bounds = array<i64: 1, 128>}, {transform_indices = @transform_3, window_bounds = array<i64: 1, 128>}, {transform_indices = @transform_4, window_bounds = array<i64: 1, 256, 128>}]} {
    %c0_i32 = arith.constant 0 : i32
    %0 = arith.cmpi eq, %arg3, %c0_i32 : i32
    %1 = arith.extui %0 : i1 to i32
    %c0_i32_0 = arith.constant 0 : i32
    %2 = arith.cmpi ne, %1, %c0_i32_0 : i32
    scf.if %2 {
      %cst_11 = arith.constant 0.000000e+00 : f32
      %13 = vector.broadcast %cst_11 : f32 to vector<256x128xf32>
      %c0_12 = arith.constant 0 : index
      %c0_13 = arith.constant 0 : index
      %14 = vector.load %arg9[%c0_12, %c0_13] : memref<256x128xf32, #tpu.memory_space<vmem>>, vector<256x128xf32>
      tpu.vector_store %arg9[%c0_12, %c0_13], %13 {strides = array<i32>} : memref<256x128xf32, #tpu.memory_space<vmem>>, vector<256x128xf32>,
    } else {
    }
    %c0 = arith.constant 0 : index
    %c0_1 = arith.constant 0 : index
    %c0_2 = arith.constant 0 : index
    %3 = vector.load %arg4[%c0, %c0_1, %c0_2] : memref<1x256x128xbf16, #tpu.memory_space<vmem>>, vector<1x256x128xbf16>
    %4 = vector.shape_cast %3 : vector<1x256x128xbf16> to vector<256x128xbf16>
    %c0_3 = arith.constant 0 : index
    %c0_4 = arith.constant 0 : index
    %5 = vector.load %arg9[%c0_3, %c0_4] : memref<256x128xf32, #tpu.memory_space<vmem>>, vector<256x128xf32>
    %c0_5 = arith.constant 0 : index
    %c0_6 = arith.constant 0 : index
    %6 = vector.load %arg5[%c0_5, %c0_6] : memref<128x128xbf16, #tpu.memory_space<vmem>>, vector<128x128xbf16>
    %cst = arith.constant dense<0.000000e+00> : vector<256x128xf32>
    %7 = tpu.matmul %4, %6, %cst {dimension_numbers = #tpu.dot_dimension_numbers<[1], [0], [0], [1], [0, 0, 1, 1], [], []>} : vector<256x128xbf16>, vector<128x128xbf16>, vector<256x128xf32> -> vector<256x128xf32>
    %8 = arith.addf %5, %7 : vector<256x128xf32>
    %c0_7 = arith.constant 0 : index
    %c0_8 = arith.constant 0 : index
    %9 = vector.load %arg9[%c0_7, %c0_8] : memref<256x128xf32, #tpu.memory_space<vmem>>, vector<256x128xf32>
    tpu.vector_store %arg9[%c0_7, %c0_8], %8 {strides = array<i32>} : memref<256x128xf32, #tpu.memory_space<vmem>>, vector<256x128xf32>,
    %c0_i32_9 = arith.constant 0 : i32
    %10 = arith.cmpi eq, %arg3, %c0_i32_9 : i32
    %11 = arith.extui %10 : i1 to i32
    %c0_i32_10 = arith.constant 0 : i32
    %12 = arith.cmpi ne, %11, %c0_i32_10 : i32
    scf.if %12 {
      %c0_11 = arith.constant 0 : index
      %c0_12 = arith.constant 0 : index
      %13 = vector.load %arg9[%c0_11, %c0_12] : memref<256x128xf32, #tpu.memory_space<vmem>>, vector<256x128xf32>
      %c0_13 = arith.constant 0 : index
      %c0_14 = arith.constant 0 : index
      %14 = vector.load %arg6[%c0_13, %c0_14] : memref<1x128xf32, #tpu.memory_space<vmem>>, vector<1x128xf32>
      %15 = vector.broadcast %14 : vector<1x128xf32> to vector<256x128xf32>
      %16 = arith.mulf %13, %15 : vector<256x128xf32>
      %c0_15 = arith.constant 0 : index
      %c0_16 = arith.constant 0 : index
      %17 = vector.load %arg7[%c0_15, %c0_16] : memref<1x128xf32, #tpu.memory_space<vmem>>, vector<1x128xf32>
      %18 = vector.broadcast %17 : vector<1x128xf32> to vector<256x128xf32>
      %19 = arith.addf %16, %18 : vector<256x128xf32>
      %cst_17 = arith.constant 0.000000e+00 : f32
      %20 = vector.broadcast %cst_17 : f32 to vector<256x128xf32>
      %21 = arith.subf %20, %19 : vector<256x128xf32>
      %22 = math.exp %21 : vector<256x128xf32>
      %cst_18 = arith.constant 1.000000e+00 : f32
      %23 = vector.broadcast %cst_18 : f32 to vector<256x128xf32>
      %24 = arith.addf %23, %22 : vector<256x128xf32>
      %25 = tpu.reciprocal %24 : vector<256x128xf32> -> vector<256x128xf32>
      %26 = arith.mulf %19, %25 : vector<256x128xf32>
      %27 = arith.truncf %26 : vector<256x128xf32> to vector<256x128xbf16>
      %c0_19 = arith.constant 0 : index
      %c0_20 = arith.constant 0 : index
      %c0_21 = arith.constant 0 : index
      %28 = vector.load %arg8[%c0_19, %c0_20, %c0_21] : memref<1x256x128xbf16, #tpu.memory_space<vmem>>, vector<1x256x128xbf16>
      %29 = vector.shape_cast %28 : vector<1x256x128xbf16> to vector<256x128xbf16>
      %30 = vector.shape_cast %27 : vector<256x128xbf16> to vector<1x256x128xbf16>
      tpu.vector_store %arg8[%c0_19, %c0_20, %c0_21], %30 {strides = array<i32>} : memref<1x256x128xbf16, #tpu.memory_space<vmem>>, vector<1x256x128xbf16>,
    } else {
    }
    return
  }
  func.func @transform_0(%arg0: i32, %arg1: i32, %arg2: i32, %arg3: i32) -> (i32, i32, i32) {
    %c0_i32 = arith.constant 0 : i32
    return %arg0, %arg1, %arg3 : i32, i32, i32
  }
  func.func @transform_1(%arg0: i32, %arg1: i32, %arg2: i32, %arg3: i32) -> (i32, i32) {
    %c0_i32 = arith.constant 0 : i32
    return %arg3, %arg2 : i32, i32
  }
  func.func @transform_2(%arg0: i32, %arg1: i32, %arg2: i32, %arg3: i32) -> (i32, i32) {
    %c0_i32 = arith.constant 0 : i32
    %c0_i32_0 = arith.constant 0 : i32
    return %c0_i32, %arg2 : i32, i32
  }
  func.func @transform_3(%arg0: i32, %arg1: i32, %arg2: i32, %arg3: i32) -> (i32, i32) {
    %c0_i32 = arith.constant 0 : i32
    %c0_i32_0 = arith.constant 0 : i32
    return %c0_i32, %arg2 : i32, i32
  }
  func.func @transform_4(%arg0: i32, %arg1: i32, %arg2: i32, %arg3: i32) -> (i32, i32, i32) {
    %c0_i32 = arith.constant 0 : i32
    return %arg0, %arg1, %arg2 : i32, i32, i32
  }
}

</mosaic_0001>

<bundles_post_ra>
// kernel: conv_matmul.1
= control target key start
LH: loop header
LB: loop body
LE: loop exit
PB: predicated region body
PF: predicated region fallthrough
CT: control target
= control target key end

     0   :  { %s1944_s15 = smov 0   ;;  %s1946_s16 = smov 0   ;;  %s2279_s0 = inlined_call_operand.vmem [shape: bf16[2,256,128], index: 0, kind: input, shape index: {}]   ;;  %s2280_s1 = inlined_call_operand.vmem [shape: bf16[128,128], index: 1, kind: input, shape index: {}]   ;;  %s2281_s2 = inlined_call_operand.vmem [shape: f32[1,128], index: 2, kind: input, shape index: {}]   ;;  %s2282_s3 = inlined_call_operand.vmem [shape: f32[1,128], index: 3, kind: input, shape index: {}]   ;;  %s2283_s4 = inlined_call_operand.vmem [shape: bf16[2,256,128], index: 4, kind: output, shape index: {}]  }
   0x1   :  { %s1948_s17 = smov 0  }
   0x2 LB: > { %s40_s18 = sadd.s32 1, %s1913_s16  ;;  %p1437_p0 = scmp.ge.s32.totalorder %s1917_s17, 1  ;;  %s1917_s17 = sphi %s1948_s17, %s14_s17   ;;  %s1913_s16 = sphi %s1946_s16, %s2285_s16   ;;  %s1909_s15 = sphi %s1944_s15, %s2284_s15  }
   0x3   : > { %p42_p1 = scmp.ge.s32.totalorder %s40_s18, 2  ;;  %p236_p2 = scmp.lt.s32.totalorder %s1917_s17, 3 }
   0x5   : > { %s2287_s18 = smov (%p42_p1, %s40_s18), 0  ;;  %p237_p3 = pnand %p1437_p0, %p236_p2 }
   0x6   : > { %v1743_v0 = vld [vmem:[%s2280_s1] sm:$0xff] (!%p237_p3)   ;;  %p291_p4 = scmp.lt.s32.totalorder (!%p237_p3), %s1909_s15, 1  ;;  %v1744_v1 = vld [vmem:[%s2280_s1 + $0x8] sm:$0xff] (!%p237_p3)   ;;  %v1745_v2 = vld [vmem:[%s2280_s1 + $0x10] sm:$0xff] (!%p237_p3)  }
   0x7   : > { %240 = sbr.rel (%p237_p3) target bundleno = 346 (0x15a), region = 36  ;;  %1655 = vmatprep.subr.bf16.mxu0 (!%p237_p3), %v1743_v0  ;;  %1703 = vmatprep.subr.bf16.mxu1 (!%p237_p3), %v1743_v0  ;;  %v1746_v3 = vld [vmem:[%s2280_s1 + $0x18] sm:$0xff] (!%p237_p3)   ;;  %v1747_v6 = vld [vmem:[%s2280_s1 + $0x20] sm:$0xff] (!%p237_p3)   ;;  %v1748_v7 = vld [vmem:[%s2280_s1 + $0x28] sm:$0xff] (!%p237_p3)  }
   0x8   : > { %1656 = vmatpush3.bf16.msra.mxu0 (!%p237_p3), %v1743_v0  ;;  %1711 = vmatpush3.bf16.msra.mxu1 (!%p237_p3), %v1743_v0  ;;  %v1749_v8 = vld [vmem:[%s2280_s1 + $0x30] sm:$0xff] (!%p237_p3)   ;;  %v1750_v9 = vld [vmem:[%s2280_s1 + $0x38] sm:$0xff] (!%p237_p3)   ;;  %v2015_v24 = vld [vmem:[%s2281_s2] ss:$0 sm:$0xff] (!%p237_p3) }
   0x9   : > { %1657 = vmatprep.subr.bf16.mxu0 (!%p237_p3), %v1744_v1  ;;  %1704 = vmatprep.subr.bf16.mxu1 (!%p237_p3), %v1744_v1  ;;  %v2020_v26 = vld [vmem:[%s2282_s3] ss:$0 sm:$0xff] (!%p237_p3) }
   0xc   : > { %1658 = vmatpush3.bf16.msra.mxu0 (!%p237_p3), %v1744_v1  ;;  %1712 = vmatpush3.bf16.msra.mxu1 (!%p237_p3), %v1744_v1 }
   0xd   : > { %1659 = vmatprep.subr.bf16.mxu0 (!%p237_p3), %v1745_v2  ;;  %1705 = vmatprep.subr.bf16.mxu1 (!%p237_p3), %v1745_v2 }
   0xe   : > { %s2289_s15 = smov (!%p291_p4, %s1909_s15), 1 }
   0xf   : > { %s1502_s25 = sshll.u32 %s2289_s15, 7 }
  0x10   : > { %s1979_s28 = scalar_lea.vmem %s2279_s0, %s1502_s25  ;;  %1660 = vmatpush3.bf16.msra.mxu0 %v1745_v2  ;;  %1713 = vmatpush3.bf16.msra.mxu1 %v1745_v2  ;;  %s2172_s23 = scalar_lea.vmem %s2283_s4, %s1502_s25 }
  0x11   : > { %v1751_v4 = vld [vmem:[%s1979_s28] sm:$0xff]   ;;  %1661 = vmatprep.subr.bf16.mxu0 %v1746_v3  ;;  %1706 = vmatprep.subr.bf16.mxu1 %v1746_v3  ;;  %v1753_v10 = vld [vmem:[%s1979_s28 + $0x8] sm:$0xff]   ;;  %v1755_v12 = vld [vmem:[%s1979_s28 + $0x10] sm:$0xff]  }
  0x12   : > { %v1752_v5 = vld [vmem:[%s1979_s28 + $0x40] sm:$0xff]   ;;  %1671 = vmatprep.mubr.bf16.mxu0 %v1751_v4  ;;  %v1754_v11 = vld [vmem:[%s1979_s28 + $0x48] sm:$0xff]   ;;  %v1756_v13 = vld [vmem:[%s1979_s28 + $0x50] sm:$0xff]  }
  0x13   : > { %1687 = vmatprep.mubr.bf16.mxu1 %v1752_v5  ;;  %v1757_v14 = vld [vmem:[%s1979_s28 + $0x18] sm:$0xff]   ;;  %v1759_v16 = vld [vmem:[%s1979_s28 + $0x20] sm:$0xff]   ;;  %v1761_v18 = vld [vmem:[%s1979_s28 + $0x28] sm:$0xff]  }
  0x14   : > { %1662 = vmatpush3.bf16.msra.mxu0 %v1746_v3  ;;  %1714 = vmatpush3.bf16.msra.mxu1 %v1746_v3  ;;  %v1758_v15 = vld [vmem:[%s1979_s28 + $0x58] sm:$0xff]   ;;  %v1760_v17 = vld [vmem:[%s1979_s28 + $0x60] sm:$0xff]   ;;  %v1762_v19 = vld [vmem:[%s1979_s28 + $0x68] sm:$0xff]  }
  0x15   : > { %1663 = vmatprep.subr.bf16.mxu0 %v1747_v6  ;;  %1707 = vmatprep.subr.bf16.mxu1 %v1747_v6  ;;  %v1763_v20 = vld [vmem:[%s1979_s28 + $0x30] sm:$0xff]   ;;  %v1765_v22 = vld [vmem:[%s1979_s28 + $0x38] sm:$0xff]  }
  0x16   : > { %v1764_v21 = vld [vmem:[%s1979_s28 + $0x70] sm:$0xff]   ;;  %v1766_v23 = vld [vmem:[%s1979_s28 + $0x78] sm:$0xff]  }
  0x18   : > { %1664 = vmatpush3.bf16.msra.mxu0 %v1747_v6  ;;  %1715 = vmatpush3.bf16.msra.mxu1 %v1747_v6 }
  0x19   : > { %1665 = vmatprep.subr.bf16.mxu0 %v1748_v7  ;;  %1708 = vmatprep.subr.bf16.mxu1 %v1748_v7 }
  0x1c   : > { %1666 = vmatpush3.bf16.msra.mxu0 %v1748_v7  ;;  %1716 = vmatpush3.bf16.msra.mxu1 %v1748_v7 }
  0x1d   : > { %1667 = vmatprep.subr.bf16.mxu0 %v1749_v8  ;;  %1709 = vmatprep.subr.bf16.mxu1 %v1749_v8 }
  0x20   : > { %1668 = vmatpush3.bf16.msra.mxu0 %v1749_v8  ;;  %1717 = vmatpush3.bf16.msra.mxu1 %v1749_v8 }
  0x21   : > { %1669 = vmatprep.subr.bf16.mxu0 %v1750_v9  ;;  %1710 = vmatprep.subr.bf16.mxu1 %v1750_v9 }
  0x24   : > { %1670 = vmatpush3.bf16.msra.mxu0 %v1750_v9  ;;  %1718 = vmatpush3.bf16.msra.mxu1 %v1750_v9 }
  0x27   : > { %1672 = vmatmul.mubr.bf16.vlgmr.msra.gmra.mrb[0].mxu0 %v1753_v10  ;;  %1688 = vmatmul.mubr.bf16.vlgmr.msra.gmra.mrb[0].mxu1 %v1754_v11 }
  0x28   : > { %1675 = vmatprep.mubr.bf16.mxu0 %v1755_v12  ;;  %1691 = vmatprep.mubr.bf16.mxu1 %v1756_v13 }
  0x2f   : > { %1676 = vmatmul.mubr.bf16.gmra.mrb[4].mxu0 %v1757_v14  ;;  %1692 = vmatmul.mubr.bf16.gmra.mrb[4].mxu1 %v1758_v15 }
  0x30   : > { %1679 = vmatprep.mubr.bf16.mxu0 %v1759_v16  ;;  %1695 = vmatprep.mubr.bf16.mxu1 %v1760_v17 }
  0x37   : > { %1680 = vmatmul.mubr.bf16.gmra.mrb[8].mxu0 %v1761_v18  ;;  %1696 = vmatmul.mubr.bf16.gmra.mrb[8].mxu1 %v1762_v19 }
  0x38   : > { %1683 = vmatprep.mubr.bf16.mxu0 %v1763_v20  ;;  %1699 = vmatprep.mubr.bf16.mxu1 %v1764_v21 }
  0x3f   : > { %1684 = vmatmul.mubr.bf16.gmra.mrb[12].mxu0 %v1765_v22  ;;  %1700 = vmatmul.mubr.bf16.gmra.mrb[12].mxu1 %v1766_v23 }
  0xfa   : > { %v1673_v25 = vpop.f32.mrb[0].mxu0  ;;  %v1689_v27 = vpop.f32.mrb[0].mxu1 }
  0xfb   : > { %v861_v28 = vmul.f32 %v1673_v25, %v2015_v24  ;;  %v877_v29 = vmul.f32 %v1689_v27, %v2015_v24  ;;  %v626_v30 = vpop.f32.mrb[1].mxu0  ;;  %v690_v31 = vpop.f32.mrb[1].mxu1 }
  0xfc   : > { %v859_v32 = vmul.f32 %v2015_v24, %v626_v30  ;;  %v875_v33 = vmul.f32 %v2015_v24, %v690_v31  ;;  %v1674_v34 = vpop.f32.mrb[2].mxu0  ;;  %v1690_v35 = vpop.f32.mrb[2].mxu1 }
  0xfd   : > { %v2027_v36 = vadd.f32 %v2020_v26, %v861_v28  ;;  %v2030_v37 = vadd.f32 %v2020_v26, %v877_v29  ;;  %v862_v38 = vmul.f32 %v1674_v34, %v2015_v24  ;;  %v878_v39 = vmul.f32 %v1690_v35, %v2015_v24  ;;  %v629_v40 = vpop.f32.mrb[3].mxu0  ;;  %v693_v41 = vpop.f32.mrb[3].mxu1 }
  0xfe   : > { %v2035_v42 = vadd.f32 %v2020_v26, %v859_v32  ;;  %v2038_v43 = vadd.f32 %v2020_v26, %v875_v33  ;;  %v860_v44 = vmul.f32 %v2015_v24, %v629_v40  ;;  %v876_v45 = vmul.f32 %v2015_v24, %v693_v41 }
  0xff   : > { %v932_v46 = vsub.f32 0.0, %v2027_v36  ;;  %v948_v47 = vsub.f32 0.0, %v2030_v37  ;;  %v2045_v48 = vadd.f32 %v2020_v26, %v862_v38  ;;  %v2048_v49 = vadd.f32 %v2020_v26, %v878_v39 }
 0x100   : > { %v930_v50 = vsub.f32 0.0, %v2035_v42  ;;  %v946_v51 = vsub.f32 0.0, %v2038_v43  ;;  %v2053_v52 = vadd.f32 %v2020_v26, %v860_v44  ;;  %v2056_v53 = vadd.f32 %v2020_v26, %v876_v45 }
 0x101   : > { %v966_v54 = vmul.f32 1.442695, %v932_v46  ;;  %v998_v55 = vmul.f32 1.442695, %v948_v47  ;;  %v933_v56 = vsub.f32 0.0, %v2045_v48  ;;  %v949_v57 = vsub.f32 0.0, %v2048_v49 }
 0x102   : > { %v962_v58 = vmul.f32 1.442695, %v930_v50  ;;  %v994_v59 = vmul.f32 1.442695, %v946_v51  ;;  %v931_v60 = vsub.f32 0.0, %v2053_v52  ;;  %v947_v61 = vsub.f32 0.0, %v2056_v53 }
 0x103   : > { %1767 = vpow2.f32 %v966_v54  ;;  %v968_v62 = vmul.f32 1.442695, %v933_v56  ;;  %v1000_v63 = vmul.f32 1.442695, %v949_v57  ;;  %v1677_v0 = vpop.f32.mrb[4].mxu0  ;;  %v1693_v1 = vpop.f32.mrb[4].mxu1 }
 0x104   : > { %1769 = vpow2.f32 %v998_v55  ;;  %v964_v2 = vmul.f32 1.442695, %v931_v60  ;;  %v996_v3 = vmul.f32 1.442695, %v947_v61  ;;  %v865_v4 = vmul.f32 %v1677_v0, %v2015_v24  ;;  %v642_v5 = vpop.f32.mrb[5].mxu0  ;;  %v706_v6 = vpop.f32.mrb[5].mxu1 }
 0x105   : > { %1771 = vpow2.f32 %v962_v58  ;;  %v881_v7 = vmul.f32 %v1693_v1, %v2015_v24  ;;  %v863_v8 = vmul.f32 %v2015_v24, %v642_v5  ;;  %v879_v9 = vmul.f32 %v2015_v24, %v706_v6  ;;  %v1678_v10 = vpop.f32.mrb[6].mxu0  ;;  %v1694_v11 = vpop.f32.mrb[6].mxu1 }
 0x106   : > { %1773 = vpow2.f32 %v994_v59  ;;  %v2067_v12 = vadd.f32 %v2020_v26, %v865_v4  ;;  %v866_v13 = vmul.f32 %v1678_v10, %v2015_v24  ;;  %v882_v14 = vmul.f32 %v1694_v11, %v2015_v24  ;;  %v645_v15 = vpop.f32.mrb[7].mxu0  ;;  %v709_v16 = vpop.f32.mrb[7].mxu1 }
 0x107   : > { %1775 = vpow2.f32 %v968_v62  ;;  %v2072_v17 = vadd.f32 %v2020_v26, %v881_v7  ;;  %v2075_v18 = vadd.f32 %v2020_v26, %v863_v8  ;;  %v2078_v19 = vadd.f32 %v2020_v26, %v879_v9 }
 0x108   : > { %1777 = vpow2.f32 %v1000_v63  ;;  %v936_v20 = vsub.f32 0.0, %v2067_v12  ;;  %v2082_v21 = vadd.f32 %v2020_v26, %v866_v13  ;;  %v2088_v28 = vadd.f32 %v2020_v26, %v882_v14 }
 0x109   : > { %1779 = vpow2.f32 %v964_v2  ;;  %v952_v22 = vsub.f32 0.0, %v2072_v17  ;;  %v934_v23 = vsub.f32 0.0, %v2075_v18  ;;  %v950_v25 = vsub.f32 0.0, %v2078_v19 }
 0x10a   : > { %1781 = vpow2.f32 %v996_v3  ;;  %v974_v27 = vmul.f32 1.442695, %v936_v20  ;;  %v1681_v29 = vpop.f32.mrb[8].mxu0  ;;  %v1697_v30 = vpop.f32.mrb[8].mxu1  ;;  %v864_v34 = vmul.f32 %v2015_v24, %v645_v15  ;;  %v937_v35 = vsub.f32 0.0, %v2082_v21 }
 0x10b   : > { %v1006_v31 = vmul.f32 1.442695, %v952_v22  ;;  %v970_v32 = vmul.f32 1.442695, %v934_v23  ;;  %v1002_v33 = vmul.f32 1.442695, %v950_v25  ;;  %v880_v38 = vmul.f32 %v2015_v24, %v709_v16 }
 0x10c   : > { %1783 = vpow2.f32 %v974_v27  ;;  %v658_v39 = vpop.f32.mrb[9].mxu0  ;;  %v722_v40 = vpop.f32.mrb[9].mxu1  ;;  %v2094_v44 = vadd.f32 %v2020_v26, %v864_v34  ;;  %v869_v45 = vmul.f32 %v1681_v29, %v2015_v24  ;;  %v885_v46 = vmul.f32 %v1697_v30, %v2015_v24 }
 0x10d   : > { %v1768_v41 = vpop.eup %1767  ;;  %1785 = vpow2.f32 %v1006_v31  ;;  %v1682_v47 = vpop.f32.mrb[10].mxu0  ;;  %v953_v55 = vsub.f32 0.0, %v2088_v28  ;;  %v2100_v56 = vadd.f32 %v2020_v26, %v880_v38  ;;  %v867_v62 = vmul.f32 %v2015_v24, %v658_v39 }
 0x10e   : > { %v1698_v50 = vpop.f32.mrb[10].mxu1  ;;  %v1770_v51 = vpop.eup %1769  ;;  %v1028_v54 = vadd.f32 1.0, %v1768_v41  ;;  %1787 = vpow2.f32 %v970_v32  ;;  %v935_v61 = vsub.f32 0.0, %v2094_v44  ;;  %v2107_v1 = vadd.f32 %v2020_v26, %v869_v45 }
 0x10f   : > { %v661_v57 = vpop.f32.mrb[11].mxu0  ;;  %v2102_v58 = vpop.f32.mrb[11].mxu1  ;;  %v1044_v60 = vadd.f32 1.0, %v1770_v51  ;;  %1789 = vpow2.f32 %v1002_v33  ;;  %v976_v4 = vmul.f32 1.442695, %v937_v35  ;;  %v2110_v5 = vadd.f32 %v2020_v26, %v885_v46 }
 0x110   : > { %v1772_v59 = vpop.eup %1771  ;;  %1791 = vrcp.f32 %v1028_v54  ;;  %v1008_v8 = vmul.f32 1.442695, %v953_v55  ;;  %v951_v9 = vsub.f32 0.0, %v2100_v56  ;;  %v972_v15 = vmul.f32 1.442695, %v935_v61 }
 0x111   : > { %v1774_v63 = vpop.eup %1773  ;;  %v1026_v0 = vadd.f32 1.0, %v1772_v59  ;;  %1793 = vrcp.f32 %v1044_v60  ;;  %v2116_v16 = vadd.f32 %v2020_v26, %v867_v62  ;;  %v940_v27 = vsub.f32 0.0, %v2107_v1 }
 0x112   : > { %v1776_v2 = vpop.eup %1775  ;;  %v1042_v3 = vadd.f32 1.0, %v1774_v63  ;;  %v1685_v10 = vpop.f32.mrb[12].mxu0  ;;  %v883_v29 = vmul.f32 %v2015_v24, %v722_v40  ;;  %v956_v33 = vsub.f32 0.0, %v2110_v5  ;;  %v870_v34 = vmul.f32 %v1682_v47, %v2015_v24 }
 0x113   : > { %v1778_v6 = vpop.eup %1777  ;;  %1795 = vrcp.f32 %v1026_v0  ;;  %v1029_v7 = vadd.f32 1.0, %v1776_v2  ;;  %v2113_v11 = vpop.f32.mrb[12].mxu1  ;;  %v886_v40 = vmul.f32 %v1698_v50, %v2015_v24  ;;  %v868_v45 = vmul.f32 %v2015_v24, %v661_v57 }
 0x114   : > { %v1780_v13 = vpop.eup %1779  ;;  %1797 = vrcp.f32 %v1042_v3  ;;  %v1045_v14 = vadd.f32 1.0, %v1778_v6  ;;  %v2118_v20 = vpop.f32.mrb[13].mxu0  ;;  %v2135_v41 = vadd.f32 %v2020_v26, %v883_v29  ;;  %v938_v54 = vsub.f32 0.0, %v2116_v16 }
 0x115   : > { %v2120_v22 = vpop.f32.mrb[13].mxu1  ;;  %v1782_v23 = vpop.eup %1781  ;;  %1799 = vrcp.f32 %v1029_v7  ;;  %v1027_v25 = vadd.f32 1.0, %v1780_v13  ;;  %v2141_v47 = vadd.f32 %v2020_v26, %v870_v34  ;;  %v2145_v61 = vadd.f32 %v2020_v26, %v886_v40 }
 0x116   : > { %v2124_v30 = vpop.f32.mrb[14].mxu0  ;;  %v2126_v31 = vpop.f32.mrb[14].mxu1  ;;  %1801 = vrcp.f32 %v1045_v14  ;;  %v1043_v32 = vadd.f32 1.0, %v1782_v23  ;;  %v954_v60 = vsub.f32 0.0, %v2135_v41  ;;  %v2149_v63 = vadd.f32 %v2020_v26, %v868_v45 }
 0x117   : > { %v2130_v35 = vpop.f32.mrb[15].mxu0  ;;  %v2132_v38 = vpop.f32.mrb[15].mxu1  ;;  %1803 = vrcp.f32 %v1027_v25  ;;  %v941_v57 = vsub.f32 0.0, %v2141_v47  ;;  %v1004_v3 = vmul.f32 1.442695, %v951_v9  ;;  %v957_v6 = vsub.f32 0.0, %v2145_v61 }
 0x118   : > { %v1784_v39 = vpop.eup %1783  ;;  %1805 = vrcp.f32 %v1043_v32  ;;  %v982_v7 = vmul.f32 1.442695, %v940_v27  ;;  %v1014_v13 = vmul.f32 1.442695, %v956_v33  ;;  %v978_v14 = vmul.f32 1.442695, %v938_v54 }
 0x119   : > { %v1786_v46 = vpop.eup %1785  ;;  %v1032_v51 = vadd.f32 1.0, %v1784_v39  ;;  %1807 = vpow2.f32 %v976_v4  ;;  %v1010_v29 = vmul.f32 1.442695, %v954_v60  ;;  %v884_v32 = vmul.f32 %v2015_v24, %v2102_v58 }
 0x11a   : > { %v1788_v55 = vpop.eup %1787  ;;  %v1048_v59 = vadd.f32 1.0, %v1786_v46  ;;  %v984_v39 = vmul.f32 1.442695, %v941_v57  ;;  %v939_v9 = vsub.f32 0.0, %v2149_v63  ;;  %v873_v40 = vmul.f32 %v1685_v10, %v2015_v24 }
 0x11b   : > { %v1790_v62 = vpop.eup %1789  ;;  %1809 = vrcp.f32 %v1032_v51  ;;  %v1030_v50 = vadd.f32 1.0, %v1788_v55  ;;  %v1016_v33 = vmul.f32 1.442695, %v957_v6 }
 0x11c   : > { %v1792_v0 = vpop.eup %1791  ;;  %1811 = vrcp.f32 %v1048_v59  ;;  %v1046_v2 = vadd.f32 1.0, %v1790_v62 }
 0x11d   : > { %v1794_v4 = vpop.eup %1793  ;;  %1813 = vrcp.f32 %v1030_v50  ;;  %v1092_v25 = vmul.f32 %v1792_v0, %v2027_v36  ;;  %v2159_v36 = vadd.f32 %v2020_v26, %v884_v32 }
 0x11e   : > { %v1796_v23 = vpop.eup %1795  ;;  %1815 = vrcp.f32 %v1046_v2  ;;  %v1108_v27 = vmul.f32 %v1794_v4, %v2030_v37  ;;  %v980_v2 = vmul.f32 1.442695, %v939_v9 }
 0x11f   : > { %v1798_v34 = vpop.eup %1797  ;;  %1817 = vpow2.f32 %v1008_v8  ;;  %v1090_v51 = vmul.f32 %v1796_v23, %v2035_v42  ;;  %v2164_v8 = vadd.f32 %v2020_v26, %v873_v40  ;;  %v955_v42 = vsub.f32 0.0, %v2159_v36 }
 0x120   : > { %v1800_v45 = vpop.eup %1799  ;;  %1819 = vpow2.f32 %v972_v15  ;;  %v1106_v10 = vmul.f32 %v1798_v34, %v2038_v43 }
 0x121   : > { %v1802_v46 = vpop.eup %1801  ;;  %v1093_v58 = vmul.f32 %v1800_v45, %v2045_v48  ;;  %1821 = vpow2.f32 %v1004_v3  ;;  %v944_v43 = vsub.f32 0.0, %v2164_v8  ;;  %v1012_v6 = vmul.f32 1.442695, %v955_v42 }
 0x122   : > { %v1804_v54 = vpop.eup %1803  ;;  %v1109_v37 = vmul.f32 %v1802_v46, %v2048_v49  ;;  %1823 = vpow2.f32 %v982_v7  ;;  %v889_v49 = vmul.f32 %v2113_v11, %v2015_v24  ;;  %v888_v42 = vmul.f32 %v2015_v24, %v2132_v38 }
 0x123   : > { %v1806_v48 = vpop.eup %1805  ;;  %v1544_v15 = vpack.c.bf16 %v1093_v58, %v1092_v25  ;;  %v1091_v55 = vmul.f32 %v1804_v54, %v2053_v52  ;;  %1825 = vpow2.f32 %v1014_v13 }
 0x124   : > { %v1808_v59 = vpop.eup %1807  ;;  %v1584_v60 = vpack.c.bf16 %v1109_v37, %v1108_v27  ;;  %v1107_v62 = vmul.f32 %v1806_v48, %v2056_v53  ;;  %1827 = vpow2.f32 %v978_v14  ;;  %v990_v53 = vmul.f32 1.442695, %v944_v43 }
 0x125   : > { %v1810_v50 = vpop.eup %1809  ;;  %1616 = vst [vmem:[%s2172_s23 + $0x8] sm:$0xff] %v1544_v15   ;;  %v1539_v57 = vpack.c.bf16 %v1091_v55, %v1090_v51  ;;  %v1033_v0 = vadd.f32 1.0, %v1808_v59  ;;  %1829 = vpow2.f32 %v1010_v29  ;;  %v2192_v11 = vadd.f32 %v2020_v26, %v889_v49 }
 0x126   : > { %v2182_v52 = vpop.eup %1811  ;;  %1624 = vst [vmem:[%s2172_s23 + $0x48] sm:$0xff] %v1584_v60   ;;  %v1579_v3 = vpack.c.bf16 %v1107_v62, %v1106_v10  ;;  %1831 = vpow2.f32 %v984_v39  ;;  %v871_v14 = vmul.f32 %v2015_v24, %v2118_v20  ;;  %v887_v29 = vmul.f32 %v2015_v24, %v2120_v22 }
 0x127   : > { %v2185_v4 = vpop.eup %1813  ;;  %1540 = vst [vmem:[%s2172_s23] sm:$0xff] %v1539_v57   ;;  %1833 = vrcp.f32 %v1033_v0  ;;  %v874_v39 = vmul.f32 %v2124_v30, %v2015_v24  ;;  %v960_v45 = vsub.f32 0.0, %v2192_v11  ;;  %v890_v20 = vmul.f32 %v2126_v31, %v2015_v24 }
 0x128   : > { %v2188_v7 = vpop.eup %1815  ;;  %1623 = vst [vmem:[%s2172_s23 + $0x40] sm:$0xff] %v1579_v3   ;;  %1835 = vpow2.f32 %v1016_v33  ;;  %v2204_v46 = vadd.f32 %v2020_v26, %v871_v14  ;;  %v872_v22 = vmul.f32 %v2015_v24, %v2130_v35  ;;  %v1096_v30 = vmul.f32 %v1810_v50, %v2067_v12 }
 0x129   : > { %v1818_v13 = vpop.eup %1817  ;;  %1837 = vpow2.f32 %v980_v2  ;;  %v2210_v54 = vadd.f32 %v2020_v26, %v887_v29  ;;  %v2213_v37 = vadd.f32 %v2020_v26, %v874_v39  ;;  %v1022_v15 = vmul.f32 1.442695, %v960_v45 }
 0x12a   : > { %v1820_v23 = vpop.eup %1819  ;;  %v1049_v25 = vadd.f32 1.0, %v1818_v13  ;;  %1839 = vpow2.f32 %v1012_v6  ;;  %v2218_v12 = vadd.f32 %v2020_v26, %v890_v20  ;;  %v942_v59 = vsub.f32 0.0, %v2204_v46 }
 0x12b   : > { %v1822_v32 = vpop.eup %1821  ;;  %v1031_v34 = vadd.f32 1.0, %v1820_v23  ;;  %1841 = vpow2.f32 %v990_v53  ;;  %v2222_v60 = vadd.f32 %v2020_v26, %v872_v22  ;;  %v958_v24 = vsub.f32 0.0, %v2210_v54 }
 0x12c   : > { %v1824_v9 = vpop.eup %1823  ;;  %1843 = vrcp.f32 %v1049_v25  ;;  %v1047_v40 = vadd.f32 1.0, %v1822_v32  ;;  %v2227_v38 = vadd.f32 %v2020_v26, %v888_v42  ;;  %v945_v0 = vsub.f32 0.0, %v2213_v37 }
 0x12d   : > { %v1826_v27 = vpop.eup %1825  ;;  %1845 = vrcp.f32 %v1031_v34  ;;  %v1036_v33 = vadd.f32 1.0, %v1824_v9  ;;  %v961_v53 = vsub.f32 0.0, %v2218_v12  ;;  %v986_v14 = vmul.f32 1.442695, %v942_v59 }
 0x12e   : > { %v1828_v51 = vpop.eup %1827  ;;  %1847 = vrcp.f32 %v1047_v40  ;;  %v1052_v58 = vadd.f32 1.0, %v1826_v27  ;;  %v943_v23 = vsub.f32 0.0, %v2222_v60  ;;  %v1018_v25 = vmul.f32 1.442695, %v958_v24 }
 0x12f   : > { %v1830_v10 = vpop.eup %1829  ;;  %1849 = vrcp.f32 %v1036_v33  ;;  %v1034_v31 = vadd.f32 1.0, %v1828_v51  ;;  %v959_v29 = vsub.f32 0.0, %v2227_v38  ;;  %v1112_v34 = vmul.f32 %v2182_v52, %v2072_v17 }
 0x130   : > { %v1832_v48 = vpop.eup %1831  ;;  %1851 = vrcp.f32 %v1052_v58  ;;  %v1050_v35 = vadd.f32 1.0, %v1830_v10  ;;  %v992_v9 = vmul.f32 1.442695, %v945_v0  ;;  %v1094_v45 = vmul.f32 %v2185_v4, %v2075_v18 }
 0x131   : > { %v1834_v55 = vpop.eup %1833  ;;  %1853 = vrcp.f32 %v1034_v31  ;;  %v1037_v43 = vadd.f32 1.0, %v1832_v48  ;;  %v1110_v20 = vmul.f32 %v2188_v7, %v2078_v19  ;;  %v1024_v33 = vmul.f32 1.442695, %v961_v53 }
 0x132   : > { %v1836_v62 = vpop.eup %1835  ;;  %v1097_v49 = vmul.f32 %v1834_v55, %v2082_v21  ;;  %1855 = vrcp.f32 %v1050_v35  ;;  %v1020_v58 = vmul.f32 1.442695, %v959_v29 }
 0x133   : > { %v1838_v50 = vpop.eup %1837  ;;  %1857 = vrcp.f32 %v1037_v43  ;;  %v1053_v57 = vadd.f32 1.0, %v1836_v62 }
 0x134   : > { %v1840_v2 = vpop.eup %1839  ;;  %v1554_v3 = vpack.c.bf16 %v1097_v49, %v1096_v30  ;;  %v1035_v6 = vadd.f32 1.0, %v1838_v50  ;;  %1859 = vpow2.f32 %v1022_v15 }
 0x135   : > { %v1842_v13 = vpop.eup %1841  ;;  %1861 = vrcp.f32 %v1053_v57  ;;  %v1051_v21 = vadd.f32 1.0, %v1840_v2 }
 0x136   : > { %v1844_v26 = vpop.eup %1843  ;;  %1618 = vst [vmem:[%s2172_s23 + $0x18] sm:$0xff] %v1554_v3   ;;  %1863 = vrcp.f32 %v1035_v6  ;;  %v1040_v55 = vadd.f32 1.0, %v1842_v13 }
 0x137   : > { %v1846_v32 = vpop.eup %1845  ;;  %v1113_v39 = vmul.f32 %v1844_v26, %v2088_v28  ;;  %1865 = vrcp.f32 %v1051_v21  ;;  %v988_v28 = vmul.f32 1.442695, %v943_v23 }
 0x138   : > { %v1848_v40 = vpop.eup %1847  ;;  %v1095_v27 = vmul.f32 %v1846_v32, %v2094_v44  ;;  %1867 = vpow2.f32 %v986_v14 }
 0x139   : > { %v1850_v22 = vpop.eup %1849  ;;  %v1594_v51 = vpack.c.bf16 %v1113_v39, %v1112_v34  ;;  %v1111_v17 = vmul.f32 %v1848_v40, %v2100_v56  ;;  %1869 = vpow2.f32 %v1018_v25 }
 0x13a   : > { %v1852_v52 = vpop.eup %1851  ;;  %v1549_v30 = vpack.c.bf16 %v1095_v27, %v1094_v45  ;;  %1871 = vpow2.f32 %v992_v9  ;;  %v1100_v56 = vmul.f32 %v1850_v22, %v2107_v1 }
 0x13b   : > { %v1854_v10 = vpop.eup %1853  ;;  %1626 = vst [vmem:[%s2172_s23 + $0x58] sm:$0xff] %v1594_v51   ;;  %v1589_v18 = vpack.c.bf16 %v1111_v17, %v1110_v20  ;;  %1873 = vpow2.f32 %v1024_v33  ;;  %v1116_v48 = vmul.f32 %v1852_v52, %v2110_v5 }
 0x13c   : > { %v1856_v19 = vpop.eup %1855  ;;  %1617 = vst [vmem:[%s2172_s23 + $0x10] sm:$0xff] %v1549_v30   ;;  %1875 = vpow2.f32 %v988_v28  ;;  %v1098_v59 = vmul.f32 %v1854_v10, %v2116_v16 }
 0x13d   : > { %v1858_v44 = vpop.eup %1857  ;;  %1625 = vst [vmem:[%s2172_s23 + $0x50] sm:$0xff] %v1589_v18   ;;  %1877 = vpow2.f32 %v1020_v58  ;;  %v1114_v1 = vmul.f32 %v1856_v19, %v2135_v41 }
 0x13e   : > { %v1860_v4 = vpop.eup %1859  ;;  %v1101_v7 = vmul.f32 %v1858_v44, %v2141_v47  ;;  %1879 = vrcp.f32 %v1040_v55 }
 0x13f   : > { %v1862_v31 = vpop.eup %1861  ;;  %v1056_v49 = vadd.f32 1.0, %v1860_v4 }
 0x140   : > { %v1864_v42 = vpop.eup %1863  ;;  %v1564_v35 = vpack.c.bf16 %v1101_v7, %v1100_v56  ;;  %v1117_v15 = vmul.f32 %v1862_v31, %v2145_v61 }
 0x141   : > { %v1866_v43 = vpop.eup %1865  ;;  %v1099_v62 = vmul.f32 %v1864_v42, %v2149_v63  ;;  %1881 = vrcp.f32 %v1056_v49 }
 0x142   : > { %1620 = vst [vmem:[%s2172_s23 + $0x28] sm:$0xff] %v1564_v35   ;;  %v1604_v47 = vpack.c.bf16 %v1117_v15, %v1116_v48  ;;  %v1115_v24 = vmul.f32 %v1866_v43, %v2159_v36  ;;  %v1868_v50 = vpop.eup %1867 }
 0x143   : > { %v1559_v5 = vpack.c.bf16 %v1099_v62, %v1098_v59  ;;  %v1870_v57 = vpop.eup %1869  ;;  %v1038_v0 = vadd.f32 1.0, %v1868_v50 }
 0x144   : > { %1628 = vst [vmem:[%s2172_s23 + $0x68] sm:$0xff] %v1604_v47   ;;  %v1599_v61 = vpack.c.bf16 %v1115_v24, %v1114_v1  ;;  %v1872_v2 = vpop.eup %1871  ;;  %v1054_v16 = vadd.f32 1.0, %v1870_v57 }
 0x145   : > { %1619 = vst [vmem:[%s2172_s23 + $0x20] sm:$0xff] %v1559_v5   ;;  %v1874_v63 = vpop.eup %1873  ;;  %1883 = vrcp.f32 %v1038_v0  ;;  %v1041_v41 = vadd.f32 1.0, %v1872_v2 }
 0x146   : > { %1627 = vst [vmem:[%s2172_s23 + $0x60] sm:$0xff] %v1599_v61   ;;  %v1876_v3 = vpop.eup %1875  ;;  %1885 = vrcp.f32 %v1054_v16  ;;  %v1057_v6 = vadd.f32 1.0, %v1874_v63 }
 0x147   : > { %v1878_v53 = vpop.eup %1877  ;;  %1887 = vrcp.f32 %v1041_v41  ;;  %v1039_v36 = vadd.f32 1.0, %v1876_v3 }
 0x148   : > { %1889 = vrcp.f32 %v1057_v6  ;;  %v1055_v13 = vadd.f32 1.0, %v1878_v53  ;;  %v1880_v21 = vpop.eup %1879 }
 0x149   : > { %1891 = vrcp.f32 %v1039_v36  ;;  %v1104_v32 = vmul.f32 %v1880_v21, %v2164_v8 }
 0x14a   : > { %1893 = vrcp.f32 %v1055_v13 }
 0x14b   : > { %v1882_v14 = vpop.eup %1881 }
 0x14c   : > { %v1120_v9 = vmul.f32 %v1882_v14, %v2192_v11 }
 0x14f   : > { %v1884_v23 = vpop.eup %1883 }
 0x150   : > { %v1886_v26 = vpop.eup %1885  ;;  %v1102_v20 = vmul.f32 %v1884_v23, %v2204_v46 }
 0x151   : > { %v1888_v25 = vpop.eup %1887  ;;  %v1118_v22 = vmul.f32 %v1886_v26, %v2210_v54 }
 0x152   : > { %v1890_v29 = vpop.eup %1889  ;;  %v1105_v34 = vmul.f32 %v1888_v25, %v2213_v37 }
 0x153   : > { %v1892_v39 = vpop.eup %1891  ;;  %v1121_v40 = vmul.f32 %v1890_v29, %v2218_v12 }
 0x154   : > { %v1894_v45 = vpop.eup %1893  ;;  %v1574_v27 = vpack.c.bf16 %v1105_v34, %v1104_v32  ;;  %v1103_v33 = vmul.f32 %v1892_v39, %v2222_v60 }
 0x155   : > { %v1614_v51 = vpack.c.bf16 %v1121_v40, %v1120_v9  ;;  %v1119_v8 = vmul.f32 %v1894_v45, %v2227_v38 }
 0x156   : > { %1622 = vst [vmem:[%s2172_s23 + $0x38] sm:$0xff] %v1574_v27   ;;  %v1569_v17 = vpack.c.bf16 %v1103_v33, %v1102_v20 }
 0x157   : > { %1630 = vst [vmem:[%s2172_s23 + $0x78] sm:$0xff] %v1614_v51   ;;  %v1609_v37 = vpack.c.bf16 %v1119_v8, %v1118_v22 }
 0x158   : > { %1621 = vst [vmem:[%s2172_s23 + $0x30] sm:$0xff] %v1569_v17  }
 0x159   : > { %1629 = vst [vmem:[%s2172_s23 + $0x70] sm:$0xff] %v1609_v37  }
 0x15a PF: > { %s14_s17 = sadd.s32 1, %s1917_s17   ;;  %s2284_s15 = smov %s1913_s16 }
 0x15b   : > { %p11_p5 = scmp.ge.s32.totalorder %s14_s17, 4   ;;  %s2285_s16 = smov %s2287_s18 }
 0x15d   :  { %13 = sbr.rel (!%p11_p5) target bundleno = 2 (0x2), region = 83 }

</bundles_post_ra>
